<compile_context>
chip_gen: v6e
topology: v6e:2x2x1
jax: 0.10.0
libtpu: 0.0.40
codegen_flags: <defaults>
</compile_context>

<pallas_src>
import functools

import jax
import jax.numpy as jnp
from jax import lax
from jax.experimental import pallas as pl
from jax.experimental.pallas import tpu as pltpu


_VMEM_LIMIT_BYTES = 32 * 1024 * 1024  # explicit scoped-VMEM budget, safe on v5e/v6e/v7x


def _compiler_params():
    return pltpu.CompilerParams(
        dimension_semantics=("parallel",),
        vmem_limit_bytes=_VMEM_LIMIT_BYTES,
    )


def _layernorm(x, g, b, eps):
    mu = jnp.mean(x, axis=-1, keepdims=True)
    var = jnp.mean(jnp.square(x - mu), axis=-1, keepdims=True)
    return (x - mu) * lax.rsqrt(var + eps) * g + b


# ----------------------------------------------------------------------------
# Kernel 1: fused embedding = input projection + positional embedding + LN
# ----------------------------------------------------------------------------
def _embed_kernel(x_ref, pos_ref, w_ref, b_ref, g_ref, beta_ref, o_ref, *, eps):
    x = x_ref[0]                                              # (S, F) f32
    h = jnp.dot(x.astype(jnp.bfloat16), w_ref[...],           # bf16 MXU, f32 accum
                preferred_element_type=jnp.float32)
    h = h + b_ref[...] + pos_ref[...]
    o_ref[0] = _layernorm(h, g_ref[...], beta_ref[...], eps).astype(o_ref.dtype)


def embed(x, pos_emb, w_in, b_in, gamma, beta, *, eps=1e-5):
    B, S, F = x.shape
    D = w_in.shape[1]
    return pl.pallas_call(
        functools.partial(_embed_kernel, eps=eps),
        out_shape=jax.ShapeDtypeStruct((B, S, D), jnp.float32),
        grid=(B,),
        in_specs=[
            pl.BlockSpec((1, S, F), lambda b: (b, 0, 0)),
            pl.BlockSpec((S, D), lambda b: (0, 0)),            # shared, stays resident
            pl.BlockSpec((F, D), lambda b: (0, 0)),
            pl.BlockSpec((1, D), lambda b: (0, 0)),
            pl.BlockSpec((1, D), lambda b: (0, 0)),
            pl.BlockSpec((1, D), lambda b: (0, 0)),
        ],
        out_specs=pl.BlockSpec((1, S, D), lambda b: (b, 0, 0)),
        compiler_params=_compiler_params(),
    )(x, pos_emb[:S], w_in, b_in, gamma, beta)


# ----------------------------------------------------------------------------
# Kernel 2: fused transformer encoder layer (attention + FFN), one batch
# element per grid step.
# ----------------------------------------------------------------------------
def _layer_kernel(h_ref, bias_ref, wqkv_ref, bqkv_ref, wo_ref, bo_ref,
                  ln1g_ref, ln1b_ref, w1_ref, b1_ref, w2_ref, b2_ref,
                  ln2g_ref, ln2b_ref, o_ref, *, n_heads, eps):
    f32 = jnp.float32
    bf16 = jnp.bfloat16

    h = h_ref[0]                                              # (S, D) f32
    S, D = h.shape
    dh = D // n_heads
    scale = 1.0 / float(dh) ** 0.5
    bias = bias_ref[0]                                        # (1, S) additive key mask

    h_b = h.astype(bf16)
    # Per-head attention, accumulated directly through the per-head Wo slabs so
    # no head-concat / transpose is ever materialized.
    ctx = jnp.zeros((S, D), f32)
    for hd in range(n_heads):                                 # static unroll
        q = jnp.dot(h_b, wqkv_ref[hd], preferred_element_type=f32) + bqkv_ref[hd]
        k = jnp.dot(h_b, wqkv_ref[n_heads + hd], preferred_element_type=f32) \
            + bqkv_ref[n_heads + hd]
        v = jnp.dot(h_b, wqkv_ref[2 * n_heads + hd], preferred_element_type=f32) \
            + bqkv_ref[2 * n_heads + hd]

        s = lax.dot_general(q.astype(bf16), k.astype(bf16),
                            dimension_numbers=(((1,), (1,)), ((), ())),
                            preferred_element_type=f32) * scale
        s = s + bias                                          # key-padding mask
        m = jnp.max(s, axis=-1, keepdims=True)
        p = jnp.exp(s - m)
        p = p * pl.reciprocal(jnp.sum(p, axis=-1, keepdims=True), approx=True)
        o_h = jnp.dot(p.astype(bf16), v.astype(bf16), preferred_element_type=f32)
        ctx = ctx + jnp.dot(o_h.astype(bf16), wo_ref[hd], preferred_element_type=f32)

    attn = ctx + bo_ref[...]
    h1 = _layernorm(h + attn, ln1g_ref[...], ln1b_ref[...], eps)

    # FFN (tanh-approx GELU matches the START/libcity BERT GELU implementation)
    ff = jnp.dot(h1.astype(bf16), w1_ref[...], preferred_element_type=f32) + b1_ref[...]
    ff = jax.nn.gelu(ff, approximate=True)
    ff = jnp.dot(ff.astype(bf16), w2_ref[...], preferred_element_type=f32) + b2_ref[...]
    h2 = _layernorm(h1 + ff, ln2g_ref[...], ln2b_ref[...], eps)

    o_ref[0] = h2.astype(o_ref.dtype)


def transformer_layer(h, bias, layer, *, n_heads, eps=1e-5):
    B, S, D = h.shape
    dh = D // n_heads
    d_ff = layer["w1"].shape[1]
    return pl.pallas_call(
        functools.partial(_layer_kernel, n_heads=n_heads, eps=eps),
        out_shape=jax.ShapeDtypeStruct((B, S, D), h.dtype),
        grid=(B,),
        in_specs=[
            pl.BlockSpec((1, S, D), lambda b: (b, 0, 0)),            # h
            pl.BlockSpec((1, 1, S), lambda b: (b, 0, 0)),            # key-padding bias
            pl.BlockSpec((3 * n_heads, D, dh), lambda b: (0, 0, 0)),  # Wq|Wk|Wv per head
            pl.BlockSpec((3 * n_heads, 1, dh), lambda b: (0, 0, 0)),  # bq|bk|bv per head
            pl.BlockSpec((n_heads, dh, D), lambda b: (0, 0, 0)),      # Wo per head
            pl.BlockSpec((1, D), lambda b: (0, 0)),                  # bo
            pl.BlockSpec((1, D), lambda b: (0, 0)),                  # ln1 gamma
            pl.BlockSpec((1, D), lambda b: (0, 0)),                  # ln1 beta
            pl.BlockSpec((D, d_ff), lambda b: (0, 0)),               # w1
            pl.BlockSpec((1, d_ff), lambda b: (0, 0)),               # b1
            pl.BlockSpec((d_ff, D), lambda b: (0, 0)),               # w2
            pl.BlockSpec((1, D), lambda b: (0, 0)),                  # b2
            pl.BlockSpec((1, D), lambda b: (0, 0)),                  # ln2 gamma
            pl.BlockSpec((1, D), lambda b: (0, 0)),                  # ln2 beta
        ],
        out_specs=pl.BlockSpec((1, S, D), lambda b: (b, 0, 0)),
        compiler_params=_compiler_params(),
    )(h, bias, layer["wqkv"], layer["bqkv"], layer["wo"], layer["bo"],
      layer["ln1_g"], layer["ln1_b"], layer["w1"], layer["b1"],
      layer["w2"], layer["b2"], layer["ln2_g"], layer["ln2_b"])


# ----------------------------------------------------------------------------
# Kernel 3: masked mean pooling (masked sum as MXU matvec, lane-dense mask)
# ----------------------------------------------------------------------------
def _mean_pool_kernel(x_ref, m_ref, o_ref):
    x = x_ref[0]                                              # (S, D) f32
    m = m_ref[0]                                              # (1, S) f32 {0,1}
    s = jnp.dot(m, x, preferred_element_type=jnp.float32)     # masked sum, (1, D)
    cnt = jnp.maximum(jnp.sum(m, axis=-1, keepdims=True), 1e-9)
    o_ref[0] = (s / cnt).astype(o_ref.dtype)


def masked_mean_pool(x, padding_masks):
    B, S, D = x.shape
    m = padding_masks.astype(jnp.float32)[:, None, :]          # (B, 1, S)
    out = pl.pallas_call(
        _mean_pool_kernel,
        out_shape=jax.ShapeDtypeStruct((B, 1, D), x.dtype),
        grid=(B,),
        in_specs=[
            pl.BlockSpec((1, S, D), lambda b: (b, 0, 0)),
            pl.BlockSpec((1, 1, S), lambda b: (b, 0, 0)),
        ],
        out_specs=pl.BlockSpec((1, 1, D), lambda b: (b, 0, 0)),
        compiler_params=_compiler_params(),
    )(x, m)
    return out[:, 0, :]


# ----------------------------------------------------------------------------
# Parameters (weights stored bf16, biases / LN params f32, per-head layouts)
# ----------------------------------------------------------------------------
def init_params(key, *, feat_dim, d_model, n_heads, n_layers, d_ff, max_len,
                weight_dtype=jnp.bfloat16):
    dh = d_model // n_heads

    def dense(k, fan_in, fan_out):
        return 0.02 * jax.random.normal(k, (fan_in, fan_out), jnp.float32)

    keys = jax.random.split(key, 2 + 6 * n_layers)
    it = iter(keys)
    w_in = dense(next(it), feat_dim, d_model)
    pos_emb = 0.02 * jax.random.normal(next(it), (max_len, d_model), jnp.float32)

    layers = []
    for _ in range(n_layers):
        wq = dense(next(it), d_model, d_model)
        wk = dense(next(it), d_model, d_model)
        wv = dense(next(it), d_model, d_model)
        wo = dense(next(it), d_model, d_model)
        w1 = dense(next(it), d_model, d_ff)
        w2 = dense(next(it), d_ff, d_model)
        # Per-head layouts so the kernel only indexes the leading axis:
        #   wqkv: (3H, D, dh) ordered [Wq heads..., Wk heads..., Wv heads...]
        #   wo:   (H, dh, D)
        wqkv = jnp.concatenate(
            [w.reshape(d_model, n_heads, dh).transpose(1, 0, 2) for w in (wq, wk, wv)],
            axis=0).astype(weight_dtype)
        layers.append(dict(
            wqkv=wqkv,
            bqkv=jnp.zeros((3 * n_heads, 1, dh), jnp.float32),
            wo=wo.reshape(n_heads, dh, d_model).astype(weight_dtype),
            bo=jnp.zeros((1, d_model), jnp.float32),
            w1=w1.astype(weight_dtype), b1=jnp.zeros((1, d_ff), jnp.float32),
            w2=w2.astype(weight_dtype), b2=jnp.zeros((1, d_model), jnp.float32),
            ln1_g=jnp.ones((1, d_model), jnp.float32),
            ln1_b=jnp.zeros((1, d_model), jnp.float32),
            ln2_g=jnp.ones((1, d_model), jnp.float32),
            ln2_b=jnp.zeros((1, d_model), jnp.float32),
        ))
    return dict(
        d_model=d_model, n_heads=n_heads,
        w_in=w_in.astype(weight_dtype),
        b_in=jnp.zeros((1, d_model), jnp.float32),
        pos_emb=pos_emb,
        ln_emb_g=jnp.ones((1, d_model), jnp.float32),
        ln_emb_b=jnp.zeros((1, d_model), jnp.float32),
        layers=layers,
    )


# ----------------------------------------------------------------------------
# Model (BERT encoder + BERTPooler + BERTContrastive forward)
# ----------------------------------------------------------------------------
def bert_encode(params, x, padding_masks):
    """x: (B, S, feat_dim), padding_masks: (B, S) bool -> (B, S, d_model)."""
    h = embed(x, params["pos_emb"], params["w_in"], params["b_in"],
              params["ln_emb_g"], params["ln_emb_b"])
    # Additive key-padding bias kept as (B, 1, S); shared by every head / layer
    # via the BlockSpec index_map (no H-fold repeat in HBM).
    bias = jnp.where(padding_masks, 0.0, -1e9).astype(jnp.float32)[:, None, :]
    for layer in params["layers"]:
        h = transformer_layer(h, bias, layer, n_heads=params["n_heads"])
    return h


def bert_pooler(bert_output, padding_masks, pooling="cls"):
    """pooling='cls' -> first token; pooling='mean' -> masked mean over seq."""
    if pooling == "cls":
        return bert_output[:, 0, :]
    return masked_mean_pool(bert_output, padding_masks)


def bert_contrastive_forward(params, x, padding_masks, g, n_feat,
                             aug_x, aug_padding_masks, aug_g, aug_n_feat,
                             pooling="cls"):
    """Returns (x1, x2), each (batch_size, d_model)."""
    # TODO(synk): the original START BERT fuses a GAT over (g, n_feat) into the
    # token embeddings; the graph encoder architecture is not provided, so g /
    # n_feat are accepted but unused here.
    del g, n_feat, aug_g, aug_n_feat
    h1 = bert_encode(params, x, padding_masks)
    x1 = bert_pooler(h1, padding_masks, pooling)
    h2 = bert_encode(params, aug_x, aug_padding_masks)
    x2 = bert_pooler(h2, aug_padding_masks, pooling)
    return x1, x2


# ----------------------------------------------------------------------------
if __name__ == "__main__":
    B, S, FEAT = 2, 8, 4
    D_MODEL, N_HEADS, N_LAYERS, D_FF = 32, 4, 2, 64
    NUM_NODES, NODE_FEAT = 10, 4

    root = jax.random.PRNGKey(0)
    kp, kx, ka, kg, kn = jax.random.split(root, 5)

    params = init_params(kp, feat_dim=FEAT, d_model=D_MODEL, n_heads=N_HEADS,
                         n_layers=N_LAYERS, d_ff=D_FF, max_len=S)

    x = jax.random.normal(kx, (B, S, FEAT), jnp.float32)
    aug_x = jax.random.normal(ka, (B, S, FEAT), jnp.float32)
    padding_masks = jnp.array([[1] * S, [1] * 5 + [0] * 3], dtype=bool)
    aug_padding_masks = jnp.array([[1] * 6 + [0] * 2, [1] * S], dtype=bool)
    g = (jax.random.uniform(kg, (NUM_NODES, NUM_NODES)) > 0.5).astype(jnp.float32)
    n_feat = jax.random.normal(kn, (NUM_NODES, NODE_FEAT), jnp.float32)
    aug_g, aug_n_feat = g, n_feat

    x1, x2 = bert_contrastive_forward(params, x, padding_masks, g, n_feat,
                                      aug_x, aug_padding_masks, aug_g, aug_n_feat,
                                      pooling="cls")
    jax.block_until_ready((x1, x2))
    assert x1.shape == (B, D_MODEL) and x2.shape == (B, D_MODEL)
    assert bool(jnp.all(jnp.isfinite(x1))) and bool(jnp.all(jnp.isfinite(x2)))

    # Also exercise the masked-mean pooling kernel.
    m1, m2 = bert_contrastive_forward(params, x, padding_masks, g, n_feat,
                                      aug_x, aug_padding_masks, aug_g, aug_n_feat,
                                      pooling="mean")
    jax.block_until_ready((m1, m2))
    assert m1.shape == (B, D_MODEL) and m2.shape == (B, D_MODEL)
    assert bool(jnp.all(jnp.isfinite(m1))) and bool(jnp.all(jnp.isfinite(m2)))

    print("KERNEL_OK")
</pallas_src>

<mosaic_0001>
module attributes {stable_mosaic.version = 11 : i64} {
  func.func @_embed_kernel(%arg0: i32, %arg1: memref<1x8x4xf32, #tpu.memory_space<vmem>>, %arg2: memref<8x32xf32, #tpu.memory_space<vmem>>, %arg3: memref<4x32xbf16, #tpu.memory_space<vmem>>, %arg4: memref<1x32xf32, #tpu.memory_space<vmem>>, %arg5: memref<1x32xf32, #tpu.memory_space<vmem>>, %arg6: memref<1x32xf32, #tpu.memory_space<vmem>>, %arg7: memref<1x8x32xf32, #tpu.memory_space<vmem>>) attributes {dimension_semantics = [#tpu.dimension_semantics<parallel>], iteration_bounds = array<i64: 2>, scalar_prefetch = 0 : i64, scratch_operands = 0 : i64, tpu.core_type = #tpu.core_type<tc>, window_params = [{transform_indices = @transform_0, window_bounds = array<i64: 1, 8, 4>}, {pipeline_mode = #tpu.pipeline_mode<synchronous>, transform_indices = @transform_1, window_bounds = array<i64: 8, 32>}, {pipeline_mode = #tpu.pipeline_mode<synchronous>, transform_indices = @transform_2, window_bounds = array<i64: 4, 32>}, {pipeline_mode = #tpu.pipeline_mode<synchronous>, transform_indices = @transform_3, window_bounds = array<i64: 1, 32>}, {pipeline_mode = #tpu.pipeline_mode<synchronous>, transform_indices = @transform_4, window_bounds = array<i64: 1, 32>}, {pipeline_mode = #tpu.pipeline_mode<synchronous>, transform_indices = @transform_5, window_bounds = array<i64: 1, 32>}, {transform_indices = @transform_6, window_bounds = array<i64: 1, 8, 32>}]} {
    %c0 = arith.constant 0 : index
    %c0_0 = arith.constant 0 : index
    %c0_1 = arith.constant 0 : index
    %0 = vector.load %arg1[%c0, %c0_0, %c0_1] : memref<1x8x4xf32, #tpu.memory_space<vmem>>, vector<1x8x4xf32>
    %1 = vector.shape_cast %0 : vector<1x8x4xf32> to vector<8x4xf32>
    %2 = arith.truncf %1 : vector<8x4xf32> to vector<8x4xbf16>
    %c0_2 = arith.constant 0 : index
    %c0_3 = arith.constant 0 : index
    %3 = vector.load %arg3[%c0_2, %c0_3] : memref<4x32xbf16, #tpu.memory_space<vmem>>, vector<4x32xbf16>
    %cst = arith.constant dense<0.000000e+00> : vector<8x32xf32>
    %4 = tpu.matmul %2, %3, %cst {dimension_numbers = #tpu.dot_dimension_numbers<[1], [0], [0], [1], [0, 0, 1, 1], [], []>} : vector<8x4xbf16>, vector<4x32xbf16>, vector<8x32xf32> -> vector<8x32xf32>
    %c0_4 = arith.constant 0 : index
    %c0_5 = arith.constant 0 : index
    %5 = vector.load %arg4[%c0_4, %c0_5] : memref<1x32xf32, #tpu.memory_space<vmem>>, vector<1x32xf32>
    %6 = vector.broadcast %5 : vector<1x32xf32> to vector<8x32xf32>
    %7 = arith.addf %4, %6 : vector<8x32xf32>
    %c0_6 = arith.constant 0 : index
    %c0_7 = arith.constant 0 : index
    %8 = vector.load %arg2[%c0_6, %c0_7] : memref<8x32xf32, #tpu.memory_space<vmem>>, vector<8x32xf32>
    %9 = arith.addf %7, %8 : vector<8x32xf32>
    %c0_8 = arith.constant 0 : index
    %c0_9 = arith.constant 0 : index
    %10 = vector.load %arg5[%c0_8, %c0_9] : memref<1x32xf32, #tpu.memory_space<vmem>>, vector<1x32xf32>
    %c0_10 = arith.constant 0 : index
    %c0_11 = arith.constant 0 : index
    %11 = vector.load %arg6[%c0_10, %c0_11] : memref<1x32xf32, #tpu.memory_space<vmem>>, vector<1x32xf32>
    %cst_12 = arith.constant dense<0.000000e+00> : vector<8xf32>
    %12 = vector.multi_reduction <add>, %9, %cst_12 [1] : vector<8x32xf32> to vector<8xf32>
    %13 = vector.shape_cast %12 : vector<8xf32> to vector<8x1xf32>
    %cst_13 = arith.constant 3.200000e+01 : f32
    %14 = vector.broadcast %cst_13 : f32 to vector<8x1xf32>
    %15 = arith.divf %13, %14 : vector<8x1xf32>
    %16 = vector.broadcast %15 : vector<8x1xf32> to vector<8x32xf32>
    %17 = arith.subf %9, %16 : vector<8x32xf32>
    %18 = arith.mulf %17, %17 : vector<8x32xf32>
    %cst_14 = arith.constant dense<0.000000e+00> : vector<8xf32>
    %19 = vector.multi_reduction <add>, %18, %cst_14 [1] : vector<8x32xf32> to vector<8xf32>
    %20 = vector.shape_cast %19 : vector<8xf32> to vector<8x1xf32>
    %cst_15 = arith.constant 3.200000e+01 : f32
    %21 = vector.broadcast %cst_15 : f32 to vector<8x1xf32>
    %22 = arith.divf %20, %21 : vector<8x1xf32>
    %23 = vector.broadcast %15 : vector<8x1xf32> to vector<8x32xf32>
    %24 = arith.subf %9, %23 : vector<8x32xf32>
    %cst_16 = arith.constant 9.99999974E-6 : f32
    %25 = vector.broadcast %cst_16 : f32 to vector<8x1xf32>
    %26 = arith.addf %22, %25 : vector<8x1xf32>
    %27 = math.rsqrt %26 : vector<8x1xf32>
    %28 = vector.broadcast %27 : vector<8x1xf32> to vector<8x32xf32>
    %29 = arith.mulf %24, %28 : vector<8x32xf32>
    %30 = vector.broadcast %10 : vector<1x32xf32> to vector<8x32xf32>
    %31 = arith.mulf %29, %30 : vector<8x32xf32>
    %32 = vector.broadcast %11 : vector<1x32xf32> to vector<8x32xf32>
    %33 = arith.addf %31, %32 : vector<8x32xf32>
    %c0_17 = arith.constant 0 : index
    %c0_18 = arith.constant 0 : index
    %c0_19 = arith.constant 0 : index
    %34 = vector.load %arg7[%c0_17, %c0_18, %c0_19] : memref<1x8x32xf32, #tpu.memory_space<vmem>>, vector<1x8x32xf32>
    %35 = vector.shape_cast %34 : vector<1x8x32xf32> to vector<8x32xf32>
    %36 = vector.shape_cast %33 : vector<8x32xf32> to vector<1x8x32xf32>
    tpu.vector_store %arg7[%c0_17, %c0_18, %c0_19], %36 {strides = array<i32>} : memref<1x8x32xf32, #tpu.memory_space<vmem>>, vector<1x8x32xf32>,
    return
  }
  func.func @transform_0(%arg0: i32) -> (i32, i32, i32) {
    %c0_i32 = arith.constant 0 : i32
    %c0_i32_0 = arith.constant 0 : i32
    %c0_i32_1 = arith.constant 0 : i32
    return %arg0, %c0_i32, %c0_i32_0 : i32, i32, i32
  }
  func.func @transform_1(%arg0: i32) -> (i32, i32) {
    %c0_i32 = arith.constant 0 : i32
    %c0_i32_0 = arith.constant 0 : i32
    %c0_i32_1 = arith.constant 0 : i32
    return %c0_i32, %c0_i32_0 : i32, i32
  }
  func.func @transform_2(%arg0: i32) -> (i32, i32) {
    %c0_i32 = arith.constant 0 : i32
    %c0_i32_0 = arith.constant 0 : i32
    %c0_i32_1 = arith.constant 0 : i32
    return %c0_i32, %c0_i32_0 : i32, i32
  }
  func.func @transform_3(%arg0: i32) -> (i32, i32) {
    %c0_i32 = arith.constant 0 : i32
    %c0_i32_0 = arith.constant 0 : i32
    %c0_i32_1 = arith.constant 0 : i32
    return %c0_i32, %c0_i32_0 : i32, i32
  }
  func.func @transform_4(%arg0: i32) -> (i32, i32) {
    %c0_i32 = arith.constant 0 : i32
    %c0_i32_0 = arith.constant 0 : i32
    %c0_i32_1 = arith.constant 0 : i32
    return %c0_i32, %c0_i32_0 : i32, i32
  }
  func.func @transform_5(%arg0: i32) -> (i32, i32) {
    %c0_i32 = arith.constant 0 : i32
    %c0_i32_0 = arith.constant 0 : i32
    %c0_i32_1 = arith.constant 0 : i32
    return %c0_i32, %c0_i32_0 : i32, i32
  }
  func.func @transform_6(%arg0: i32) -> (i32, i32, i32) {
    %c0_i32 = arith.constant 0 : i32
    %c0_i32_0 = arith.constant 0 : i32
    %c0_i32_1 = arith.constant 0 : i32
    return %arg0, %c0_i32, %c0_i32_0 : i32, i32, i32
  }
}

</mosaic_0001>

<bundles_post_ra>
// kernel: tpu_custom_call.1
= control target key start
LH: loop header
LB: loop body
LE: loop exit
PB: predicated region body
PF: predicated region fallthrough
CT: control target
= control target key end

     0   :  { %11 = vsyncpa [#allocation3], 0  ;;  %s683_s0 = inlined_call_operand.vmem [shape: f32[2,8,4], index: 0, kind: input, shape index: {}]   ;;  %s684_s1 = inlined_call_operand.vmem [shape: f32[8,32], index: 1, kind: input, shape index: {}]   ;;  %s685_s2 = inlined_call_operand.vmem [shape: bf16[4,32], index: 2, kind: input, shape index: {}]   ;;  %s686_s3 = inlined_call_operand.vmem [shape: f32[1,32], index: 3, kind: input, shape index: {}]   ;;  %s687_s4 = inlined_call_operand.vmem [shape: f32[1,32], index: 4, kind: input, shape index: {}]   ;;  %s688_s5 = inlined_call_operand.vmem [shape: f32[1,32], index: 5, kind: input, shape index: {}]   ;;  %s689_s6 = inlined_call_operand.hbm [shape: f32[2,8,32], index: 6, kind: output, shape index: {}]  }
   0x1   :  { %13 = vsyncpa [#allocation3 + $0x1], 0  ;;  %s578_s21 = smov 0   ;;  %s580_s22 = smov 0  }
   0x2   :  { %s582_s23 = smov 0   ;;  %s584_s24 = smov 0  }
   0x3 LB: > { %s599_s25 = sadd.s32 4294967295, %s538_s24   ;;  %s413_s26 = sadd.s32 4294967294, %s538_s24   ;;  %s538_s24 = sphi %s584_s24, %s695_s24   ;;  %s534_s23 = sphi %s582_s23, %s694_s23   ;;  %s530_s22 = sphi %s580_s22, %s693_s22   ;;  %s526_s21 = sphi %s578_s21, %s692_s21  }
   0x4   : > { %s603_s27 = sadd.s32 1, %s538_s24   ;;  %s157_s28 = sadd.s32 1, %s534_s23 }
   0x5   : > { %s154_s29 = ssub.s32 %s538_s24, %s603_s27  ;;  %p167_p0 = scmp.ne.s32.totalorder %s534_s23, %s530_s22 }
   0x6   : > { %p155_p1 = scmp.eq.s32.totalorder %s154_s29, 0  ;;  %p168_p2 = scmp.eq.s32.totalorder %s599_s25, 1 }
   0x7   : > { %p173_p3 = scmp.ne.s32.totalorder %s530_s22, %s526_s21  ;;  %p174_p4 = scmp.eq.s32.totalorder %s413_s26, 1 }
   0x8   : > { %s614_s30 = scalar_select %p155_p1, %s534_s23, %s157_s28  }
   0x9   : > { %p616_p5 = por %p168_p2, %p167_p0  ;;  %p620_p6 = por %p174_p4, %p173_p3 }
   0xa   : > { %p416_p7 = scmp.ge.s32.totalorder %s538_s24, 1  ;;  %p214_p8 = scmp.lt.s32.totalorder %s538_s24, 3 }
   0xc   : > { %p215_p9 = pnand %p416_p7, %p214_p8 }
   0xd   : > { %p243_p10 = scmp.lt.s32.totalorder (!%p215_p9), %s599_s25, 1  ;;  %s240_s20 = sand.u32 (!%p215_p9), 1, %s530_s22  }
   0xe   : > { %218 = sbr.rel (%p215_p9) target bundleno = 544 (0x220), region = 44  ;;  %s417_s26 = sshll.u32 (!%p215_p9), %s240_s20, 3 }
   0xf   : > { %s341_s17 = scalar_lea.sflag (!%p215_p9), [#allocation3], %s240_s20  ;;  %s542_s19 = smov (!%p215_p9), [#allocation2]  }
  0x10   : > { %s482_s28 = sshll.u32 (!%p215_p9), %s542_s19, 4  ;;  %s483_s28 = int_to_ptr.vmem [resolvable:$false] %s482_s28 }
  0x13   : > { %v250_v0 = vld [vmem:[%s685_s2] sm:$0x3]  ;;  %vm262_vm0 = vcmask 1041408   ;;  %v540_v1 = vmov 0.0   ;;  %vm541_vm1 = vmmov 0   ;;  %s244_s11 = scalar_select %p243_p10, %s599_s25, 1 }
  0x14   : > { %429 = vmatprep.subr.bf16.mxu0 %v540_v1  ;;  %v264_v2 = vsel %vm262_vm0, %v250_v0, 0  ;;  %431 = vmatprep.mubr.msk.bf16.mxu0 %vm541_vm1, %v540_v1  ;;  %vm258_vm2 = vcmask 31744   ;;  %v419_v5 = vld [vmem:[%s686_s3] ss:$0 sm:$0xff]  ;;  %vm310_vm3 = vcmask 261120  }
  0x15   : > { %430 = vmatpush3.bf16.msra.mxu0 %v264_v2  ;;  %s418_s12 = sshll.u32 %s244_s11, 3  ;;  %v306_v7 = vld [vmem:[%s684_s1] sm:$0xff]  ;;  %s424_s11 = sshll.u32 %s599_s25, 7 }
  0x16   : > { %s246_s15 = scalar_lea.vmem %s683_s0, %s418_s12  ;;  %v421_v23 = vld [vmem:[%s687_s4] ss:$0 sm:$0xff]  ;;  %s242_s12 = scalar_lea.vmem [#allocation2], %s417_s26 }
  0x17   : > { %v248_v3 = vld [vmem:[%s246_s15] sm:$0xff]  ;;  %s354_s13 = sshll.u32 %s242_s12, 4  ;;  %s352_s16 = scalar_lea.hbm %s689_s6, %s424_s11  ;;  %s355_s13 = int_to_ptr.vmem [resolvable:$true] %s354_s13 }
  0x18   : > { %v249_v4 = vpack.c.bf16 %v248_v3, %v248_v3  ;;  %v422_v25 = vld [vmem:[%s688_s5] ss:$0 sm:$0xff]  ;;  %s478_s18 = scalar_lea.vmem %s355_s13, 128  ;;  %s484_s25 = scalar_lea.vmem %s483_s28, 256 }
  0x19   : > { %p479_p11 = scmp.ne.s32.totalorder %s355_s13, %s478_s18  ;;  %p485_p0 = scmp.lt.s32.totalorder %s355_s13, %s483_s28 }
  0x1a   : > { %432 = vmatmul.mubr.msk.bf16.vlgmr.msra.gmra.mxu0 %vm258_vm2, %v249_v4  ;;  %p486_p1 = scmp.lt.s32.totalorder %s484_s25, %s478_s18 }
  0x1b   : > { %p480_p12 = pnand %p479_p11, %p616_p5 }
  0x1c   : > { %p487_p2 = por %p486_p1, %p485_p0 }
  0x1d   : > { %p481_p13 = pneg %p480_p12 }
  0x1f   : > { %p488_p3 = pnand %p487_p2, %p481_p13 }
  0xda   : > { %v300_v6 = vpop.f32.mrf.mxu0 }
  0xdb   : > { %v301_v8 = vadd.f32 %v419_v5, %v300_v6 }
  0xdc   : > { %v433_v9 = vpop.f32.mrf.mxu0 }
  0xdd   : > { %v307_v10 = vadd.f32 %v306_v7, %v301_v8 }
  0xde   : > { %v303_v11 = vpop.f32.mrf.mxu0 }
  0xdf   : > { %v311_v12 = vsel %vm310_vm3, %v307_v10, 0.0 }
  0xe0   : > { %312 = vadd.xlane.f32.xlu0 %v311_v12  ;;  %v434_v13 = vpop.f32.mrf.mxu0 }
 0x169   : > { %v313_v14 = vpop.xlane.xlu0 %312 }
 0x16a   : > { %v315_v15 = vmul.f32 0.03125, %v313_v14 }
 0x16c   : > { %v316_v16 = vsub.f32 %v307_v10, %v315_v15 }
 0x16e   : > { %v317_v17 = vmul.f32 %v316_v16, %v316_v16 }
 0x170   : > { %v318_v18 = vsel %vm310_vm3, %v317_v17, 0.0 }
 0x171   : > { %319 = vadd.xlane.f32.xlu0 %v318_v18 }
 0x1fa   : > { %v320_v19 = vpop.xlane.xlu0 %319 }
 0x1fb   : > { %v321_v20 = vmul.f32 0.03125, %v320_v19 }
 0x1fd   : > { %v322_v21 = vadd.f32 1e-05, %v321_v20 }
 0x1ff   : > { %476 = vrsqrt.f32 %v322_v21 }
 0x20c   : > { %v477_v22 = vpop.eup %476 }
 0x20d   : > { %v324_v24 = vmul.f32 %v477_v22, %v316_v16 }
 0x20f   : > { %v331_v26 = vmul.f32 %v421_v23, %v324_v24 }
 0x211   : > { %v338_v27 = vadd.f32 %v422_v25, %v331_v26 }
 0x213   : > { %339 = vst.msk [vmem:[%s242_s12] sm:$0xff] %vm310_vm3, %v338_v27 }
 0x214   : > { %491 = shalt.err (!%p488_p3)
}
 0x215   : > { %s492_s26 = scalar_lea.hbm %s352_s16, 128  ;;  %s496_s9 = scalar_lea.hbm %s689_s6, 256 }
 0x216   : > { %p493_p4 = scmp.ne.s32.totalorder %s352_s16, %s492_s26  ;;  %p497_p9 = scmp.lt.s32.totalorder %s352_s16, %s689_s6 }
 0x217   : > { %p498_p10 = scmp.lt.s32.totalorder %s496_s9, %s492_s26 }
 0x218   : > { %p494_p7 = pnand %p493_p4, %p616_p5 }
 0x219   : > { %p499_p11 = por %p498_p10, %p497_p9 }
 0x21a   : > { %p495_p8 = pneg %p494_p7 }
 0x21c   : > { %p500_p12 = pnand %p499_p11, %p495_p8 }
 0x21e   : > { %503 = shalt.err (!%p500_p12)
}
 0x21f   : > { %435 = dma.vmem_to_hbm [thread:$0]  (%p616_p5), %s355_s13, 128, %s352_s16, %s341_s17  }
 0x220 PF: > { %p441_p13 = scmp.ge.s32.totalorder %s538_s24, 2  ;;  %s366_s12 = sand.u32 1, %s526_s21  }
 0x221   : > { %s367_s14 = scalar_lea.sflag [#allocation3], %s366_s12 }
 0x222   : > { %p438_p0 = pnand %p441_p13, %p620_p6 }
 0x224   : > { %p439_p1 = pneg %p438_p0 }
 0x226   : > { %521 = dma.done.wait (%p439_p1), %s367_s14, 128  }
 0x227   : > { %523 = vsyncadd (%p439_p1), %s367_s14, 4294967168  ;;  %p16_p2 = scmp.ge.s32.totalorder %s603_s27, 4   ;;  %s692_s21 = smov %s530_s22 }
 0x228   : > { %s693_s22 = smov %s534_s23  ;;  %s694_s23 = smov %s614_s30 }
 0x229   : > { %s695_s24 = smov %s603_s27  ;;  %18 = sbr.rel (!%p16_p2) target bundleno = 3 (0x3), region = 79 }
 0x22e   :  { %372 = vsyncpa [#allocation3], 1 }
 0x22f   :  { %374 = vsyncpa [#allocation3 + $0x1], 1 }

</bundles_post_ra>
